<compile_context>
chip_gen: v7x
topology: tpu7x:2x2x1
jax: 0.10.0
libtpu: 0.0.40
codegen_flags: <defaults>
</compile_context>

<pallas_src>
import functools

import jax
import jax.numpy as jnp
from jax.experimental import pallas as pl
from jax.experimental.pallas import tpu as pltpu

LANES = 128
_WIDTH_CANDIDATES = (2048, 1024, 512, 256, 128)
# Double-buffered VMEM footprint budget: 2*(N+1)*block_bytes <= this.
_VMEM_FOOTPRINT_BUDGET = 16 * 1024 * 1024
_MAX_BLOCK_BYTES = 2 * 1024 * 1024
_VMEM_LIMIT_BYTES = 32 * 1024 * 1024  # safe on v5e/v6e (128 MiB) and v7x (64 MiB)


def _sum_kernel(*refs, acc_dtype):
    """refs = (in_ref_0, ..., in_ref_{N-1}, out_ref). Elementwise sum."""
    out_ref = refs[-1]
    in_refs = refs[:-1]
    # Pairwise (tree) accumulation: shorter dependency chain on the VPU,
    # though this op is HBM-bound either way.
    vals = [r[...].astype(acc_dtype) for r in in_refs]
    while len(vals) > 1:
        nxt = [vals[i] + vals[i + 1] for i in range(0, len(vals) - 1, 2)]
        if len(vals) % 2 == 1:
            nxt.append(vals[-1])
        vals = nxt
    out_ref[...] = vals[0].astype(out_ref.dtype)


def _sublane_multiple(dtype) -> int:
    # 8 rows for 32-bit, 16 for bf16/fp16, 32 for int8/fp8 (sublane packing).
    itemsize = jnp.dtype(dtype).itemsize
    return max(8, 32 // max(itemsize, 1))


def _choose_width(total: int, sub_mult: int):
    """Pick a wide lane-dense last dim; prefer one leaving >= sub_mult rows."""
    dividing = [w for w in _WIDTH_CANDIDATES if total % w == 0]
    for w in dividing:
        if total // w >= sub_mult:
            return w, False
    if dividing:
        return dividing[0], False
    # total not a multiple of 128: fall back to a padded slab (rare; typical
    # NCHW/NHWC activation counts are 128-aligned).
    return 1024, True


def sum_output(branch_tensors: dict[int, jax.Array]) -> jax.Array:
    """Pallas implementation of SumOutput.forward.

    All branch tensors must share shape and dtype (as torch.stack requires).
    """
    tensors = list(branch_tensors.values())
    assert len(tensors) >= 1
    shape = tensors[0].shape
    dtype = tensors[0].dtype
    for t in tensors:
        assert t.shape == shape and t.dtype == dtype

    total = 1
    for d in shape:
        total *= d

    itemsize = jnp.dtype(dtype).itemsize
    sub_mult = _sublane_multiple(dtype)
    width, needs_pad = _choose_width(total, sub_mult)

    if needs_pad:
        # TODO(synk): tail handled by padding each branch (one extra HBM copy
        # per branch); only hit when element count is not a multiple of 128.
        padded_total = pl.cdiv(total, width) * width
        rows = padded_total // width
        flat = []
        for t in tensors:
            f = jnp.reshape(t, (-1,))
            f = jnp.pad(f, (0, padded_total - total))
            flat.append(jnp.reshape(f, (rows, width)))
    else:
        rows = total // width
        # Pure reshape: no padding copy, no extra HBM round trip per branch.
        flat = [jnp.reshape(t, (rows, width)) for t in tensors]

    n_in = len(flat)

    # Block sizing: ~0.5-2 MiB per buffer, 2*(N+1) buffers under the budget.
    per_buf_bytes = min(_MAX_BLOCK_BYTES,
                        _VMEM_FOOTPRINT_BUDGET // (2 * (n_in + 1)))
    row_bytes = width * itemsize
    target_rows = max(sub_mult,
                      (per_buf_bytes // row_bytes) // sub_mult * sub_mult)
    block_rows = rows if rows <= target_rows else target_rows

    grid = (pl.cdiv(rows, block_rows),)
    block = (block_rows, width)
    spec = pl.BlockSpec(block, lambda i: (i, 0))

    if jnp.issubdtype(dtype, jnp.floating) and itemsize < 4:
        acc_dtype = jnp.float32
    else:
        acc_dtype = dtype

    out2d = pl.pallas_call(
        functools.partial(_sum_kernel, acc_dtype=acc_dtype),
        out_shape=jax.ShapeDtypeStruct((rows, width), dtype),
        grid_spec=pltpu.PrefetchScalarGridSpec(
            num_scalar_prefetch=0,
            grid=grid,
            in_specs=[spec] * n_in,
            out_specs=spec,
        ),
        compiler_params=pltpu.CompilerParams(
            dimension_semantics=("parallel",),
            vmem_limit_bytes=_VMEM_LIMIT_BYTES,
        ),
    )(*flat)

    if needs_pad:
        out_flat = jnp.reshape(out2d, (-1,))[:total]
        return jnp.reshape(out_flat, shape)
    return jnp.reshape(out2d, shape)


if __name__ == "__main__":
    # Small NCHW branch tensors: 3 branches of shape (2, 4, 16, 16).
    key = jax.random.PRNGKey(0)
    k0, k1, k2 = jax.random.split(key, 3)
    shape = (2, 4, 16, 16)
    branches = {
        0: jax.random.normal(k0, shape, dtype=jnp.float32),
        1: jax.random.normal(k1, shape, dtype=jnp.float32),
        2: jax.random.normal(k2, shape, dtype=jnp.float32),
    }

    out = sum_output(branches)
    out = jax.block_until_ready(out)

    ref = branches[0] + branches[1] + branches[2]
    assert out.shape == shape, out.shape
    assert out.dtype == ref.dtype, out.dtype
    assert jnp.allclose(out, ref, atol=1e-5, rtol=1e-5), "mismatch vs reference"

    print("KERNEL_OK")
</pallas_src>

<mosaic_0001>
module attributes {stable_mosaic.version = 11 : i64} {
  func.func @_sum_kernel(%arg0: i32, %arg1: memref<8x256xf32, #tpu.memory_space<vmem>>, %arg2: memref<8x256xf32, #tpu.memory_space<vmem>>, %arg3: memref<8x256xf32, #tpu.memory_space<vmem>>, %arg4: memref<8x256xf32, #tpu.memory_space<vmem>>) attributes {dimension_semantics = [#tpu.dimension_semantics<parallel>], iteration_bounds = array<i64: 1>, scalar_prefetch = 0 : i64, scratch_operands = 0 : i64, tpu.core_type = #tpu.core_type<tc>, window_params = [{transform_indices = @transform_0, window_bounds = array<i64: 8, 256>}, {transform_indices = @transform_1, window_bounds = array<i64: 8, 256>}, {transform_indices = @transform_2, window_bounds = array<i64: 8, 256>}, {transform_indices = @transform_3, window_bounds = array<i64: 8, 256>}]} {
    %c0 = arith.constant 0 : index
    %c0_0 = arith.constant 0 : index
    %0 = vector.load %arg1[%c0, %c0_0] : memref<8x256xf32, #tpu.memory_space<vmem>>, vector<8x256xf32>
    %c0_1 = arith.constant 0 : index
    %c0_2 = arith.constant 0 : index
    %1 = vector.load %arg2[%c0_1, %c0_2] : memref<8x256xf32, #tpu.memory_space<vmem>>, vector<8x256xf32>
    %c0_3 = arith.constant 0 : index
    %c0_4 = arith.constant 0 : index
    %2 = vector.load %arg3[%c0_3, %c0_4] : memref<8x256xf32, #tpu.memory_space<vmem>>, vector<8x256xf32>
    %3 = arith.addf %0, %1 : vector<8x256xf32>
    %4 = arith.addf %3, %2 : vector<8x256xf32>
    %c0_5 = arith.constant 0 : index
    %c0_6 = arith.constant 0 : index
    %5 = vector.load %arg4[%c0_5, %c0_6] : memref<8x256xf32, #tpu.memory_space<vmem>>, vector<8x256xf32>
    tpu.vector_store %arg4[%c0_5, %c0_6], %4 {strides = array<i32>} : memref<8x256xf32, #tpu.memory_space<vmem>>, vector<8x256xf32>,
    return
  }
  func.func @transform_0(%arg0: i32) -> (i32, i32) {
    %c0_i32 = arith.constant 0 : i32
    %c0_i32_0 = arith.constant 0 : i32
    return %arg0, %c0_i32 : i32, i32
  }
  func.func @transform_1(%arg0: i32) -> (i32, i32) {
    %c0_i32 = arith.constant 0 : i32
    %c0_i32_0 = arith.constant 0 : i32
    return %arg0, %c0_i32 : i32, i32
  }
  func.func @transform_2(%arg0: i32) -> (i32, i32) {
    %c0_i32 = arith.constant 0 : i32
    %c0_i32_0 = arith.constant 0 : i32
    return %arg0, %c0_i32 : i32, i32
  }
  func.func @transform_3(%arg0: i32) -> (i32, i32) {
    %c0_i32 = arith.constant 0 : i32
    %c0_i32_0 = arith.constant 0 : i32
    return %arg0, %c0_i32 : i32, i32
  }
}

</mosaic_0001>

<bundles_post_ra>
// kernel: tpu_custom_call.1
= control target key start
LH: loop header
LB: loop body
LE: loop exit
PB: predicated region body
PF: predicated region fallthrough
CT: control target
= control target key end

     0   :  { %8 = vsyncpa [#allocation3], 0  ;;  %s248_s0 = inlined_call_operand.hbm [shape: f32[8,256], index: 0, kind: input, shape index: {}]   ;;  %s249_s1 = inlined_call_operand.hbm [shape: f32[8,256], index: 1, kind: input, shape index: {}]   ;;  %s250_s2 = inlined_call_operand.hbm [shape: f32[8,256], index: 2, kind: input, shape index: {}]   ;;  %s251_s3 = inlined_call_operand.hbm [shape: f32[8,256], index: 3, kind: output, shape index: {}]  }
   0x1   :  { %9 = vsyncpa [#allocation6], 0 }
   0x2   :  { %10 = vsyncpa [#allocation4], 0  ;;  %s176_s12 = smov [#allocation5]   ;;  %s177_s14 = smov [#allocation2]  }
   0x3   :  { %s27_s13 = sshll.u32 %s176_s12, 4  ;;  %s17_s15 = sshll.u32 %s177_s14, 4  ;;  %s28_s13 = int_to_ptr.vmem [resolvable:$true] %s27_s13  ;;  %s18_s15 = int_to_ptr.vmem [resolvable:$true] %s17_s15 }
   0x4   :  { %s82_s18 = scalar_lea.hbm %s249_s1, 256 }
   0x5   :  { %p83_p0 = scmp.ne.s32.totalorder %s249_s1, %s82_s18  ;;  %p86_p1 = scmp.lt.u32.totalorder %s82_s18, %s249_s1 }
   0x7   :  { %p88_p2 = pnand %p86_p1, %p83_p0 }
   0x9   :  { %91 = shalt.err (!%p88_p2)
}
   0xa   :  { %s92_s23 = scalar_lea.vmem %s28_s13, 256  ;;  %p97_p4 = scmp.lt.s32.totalorder %s28_s13, %s28_s13 }
   0xb   :  { %p93_p3 = scmp.ne.s32.totalorder %s28_s13, %s92_s23  ;;  %p98_p5 = scmp.lt.s32.totalorder %s92_s23, %s92_s23 }
   0xd   :  { %p99_p6 = por %p98_p5, %p97_p4 }
   0xf   :  { %p100_p7 = pnand %p99_p6, %p93_p3 }
  0x11   :  { %103 = shalt.err (!%p100_p7)
}
  0x12   :  { %30 = dma.hbm_to_vmem [thread:$0]  %s249_s1, 256, %s28_s13, [#allocation6]  }
  0x13   :  { %s104_s28 = scalar_lea.hbm %s248_s0, 256 }
  0x14   :  { %p105_p8 = scmp.ne.s32.totalorder %s248_s0, %s104_s28  ;;  %p108_p9 = scmp.lt.u32.totalorder %s104_s28, %s248_s0 }
  0x16   :  { %p110_p10 = pnand %p108_p9, %p105_p8 }
  0x18   :  { %113 = shalt.err (!%p110_p10)
}
  0x19   :  { %s114_s6 = scalar_lea.vmem %s18_s15, 256  ;;  %p119_p12 = scmp.lt.s32.totalorder %s18_s15, %s18_s15 }
  0x1a   :  { %p115_p11 = scmp.ne.s32.totalorder %s18_s15, %s114_s6  ;;  %p120_p13 = scmp.lt.s32.totalorder %s114_s6, %s114_s6 }
  0x1c   :  { %p121_p0 = por %p120_p13, %p119_p12 }
  0x1e   :  { %p122_p1 = pnand %p121_p0, %p115_p11 }
  0x20   :  { %125 = shalt.err (!%p122_p1)
}
  0x21   :  { %20 = dma.hbm_to_vmem [thread:$0]  %s248_s0, 256, %s18_s15, [#allocation3]  }
  0x22   :  { %s178_s8 = smov [#allocation7]   ;;  %s126_s12 = scalar_lea.hbm %s250_s2, 256 }
  0x23   :  { %s37_s9 = sshll.u32 %s178_s8, 4  ;;  %p127_p2 = scmp.ne.s32.totalorder %s250_s2, %s126_s12  ;;  %s38_s9 = int_to_ptr.vmem [resolvable:$true] %s37_s9 }
  0x24   :  { %p130_p3 = scmp.lt.u32.totalorder %s126_s12, %s250_s2 }
  0x26   :  { %p132_p4 = pnand %p130_p3, %p127_p2 }
  0x28   :  { %135 = shalt.err (!%p132_p4)
}
  0x29   :  { %s136_s18 = scalar_lea.vmem %s38_s9, 256  ;;  %p141_p6 = scmp.lt.s32.totalorder %s38_s9, %s38_s9 }
  0x2a   :  { %p137_p5 = scmp.ne.s32.totalorder %s38_s9, %s136_s18  ;;  %p142_p7 = scmp.lt.s32.totalorder %s136_s18, %s136_s18 }
  0x2c   :  { %p143_p8 = por %p142_p7, %p141_p6 }
  0x2e   :  { %p144_p9 = pnand %p143_p8, %p137_p5 }
  0x30   :  { %147 = shalt.err (!%p144_p9)
}
  0x31   :  { %40 = dma.hbm_to_vmem [thread:$0]  %s250_s2, 256, %s38_s9, [#allocation6]  }
  0x32   :  { %170 = dma.done.wait [#allocation3], 256  }
  0x33   :  { %171 = vsyncadd [#allocation3], 4294967040 }
  0x34   :  { %172 = dma.done.wait [#allocation6], 512  }
  0x35   :  { %173 = vsyncadd [#allocation6], 4294966784  ;;  %v50_v0 = vld [vmem:[#allocation2] sm:$0xff]  ;;  %v52_v1 = vld [vmem:[#allocation5] sm:$0xff]  ;;  %s179_s19 = smov [#allocation8]  }
  0x36   :  { %v54_v2 = vld [vmem:[#allocation7] sm:$0xff]  ;;  %v56_v3 = vadd.f32 %v52_v1, %v50_v0  ;;  %v51_v4 = vld [vmem:[#allocation2 + $0x8] sm:$0xff]  ;;  %v53_v5 = vld [vmem:[#allocation5 + $0x8] sm:$0xff]  ;;  %s68_s20 = sshll.u32 %s179_s19, 4  ;;  %s69_s20 = int_to_ptr.vmem [resolvable:$true] %s68_s20 }
  0x37   :  { %v55_v6 = vld [vmem:[#allocation7 + $0x8] sm:$0xff]  ;;  %v57_v7 = vadd.f32 %v53_v5, %v51_v4  ;;  %s148_s2 = scalar_lea.vmem %s69_s20, 256  ;;  %p153_p11 = scmp.lt.s32.totalorder %s69_s20, %s69_s20 }
  0x38   :  { %v58_v8 = vadd.f32 %v56_v3, %v54_v2  ;;  %p149_p10 = scmp.ne.s32.totalorder %s69_s20, %s148_s2  ;;  %p154_p12 = scmp.lt.s32.totalorder %s148_s2, %s148_s2 }
  0x39   :  { %v59_v9 = vadd.f32 %v57_v7, %v55_v6 }
  0x3a   :  { %60 = vst [vmem:[#allocation8] sm:$0xff] %v58_v8  ;;  %p155_p13 = por %p154_p12, %p153_p11 }
  0x3b   :  { %61 = vst [vmem:[#allocation8 + $0x8] sm:$0xff] %v59_v9 }
  0x3c   :  { %p156_p0 = pnand %p155_p13, %p149_p10 }
  0x3e   :  { %159 = shalt.err (!%p156_p0)
}
  0x3f   :  { %s160_s23 = scalar_lea.hbm %s251_s3, 256 }
  0x40   :  { %p161_p1 = scmp.ne.s32.totalorder %s251_s3, %s160_s23  ;;  %p164_p2 = scmp.lt.u32.totalorder %s160_s23, %s251_s3 }
  0x42   :  { %p166_p3 = pnand %p164_p2, %p161_p1 }
  0x44   :  { %169 = shalt.err (!%p166_p3)
}
  0x45   :  { %71 = dma.vmem_to_hbm [thread:$0]  %s69_s20, 256, %s251_s3, [#allocation4]  }
  0x46   :  { %174 = dma.done.wait [#allocation4], 256  }
  0x47   :  { %175 = vsyncadd [#allocation4], 4294967040 }
  0x48   :  { %75 = vsyncpa [#allocation3], 1 }
  0x49   :  { %76 = vsyncpa [#allocation6], 1 }
  0x4a   :  { %77 = vsyncpa [#allocation4], 1 }

</bundles_post_ra>
